<compile_context>
chip_gen: v7x
topology: tpu7x:2x2x1
jax: 0.10.0
libtpu: 0.0.40
codegen_flags: <defaults>
</compile_context>

<pallas_src>
import functools
import math

import jax
import jax.numpy as jnp
from jax.experimental import pallas as pl
from jax.experimental.pallas import tpu as pltpu

EPS = 0.003          # fc4 weight init range, as in the PyTorch module
HID3_PAD = 128       # fc3's 64 hidden units zero-padded to one full lane width


def _round_up(x, m):
    return -(-x // m) * m


def _pick_tile(n, max_tile):
    """Rows of the batch handled per grid step.

    n <= max_tile   -> single block (small-batch latency path).
    n  > max_tile   -> round the step count up to an EVEN number (both v7x
                       TensorCores stay busy under "parallel" semantics) and
                       the tile up to a sublane multiple of 8.
    """
    if n <= max_tile:
        return n
    steps = pl.cdiv(n, max_tile)
    if steps % 2:
        steps += 1
    return _round_up(pl.cdiv(n, steps), 8)


# ---------------------------------------------------------------------------
# Fused Actor kernel: 4 Linears + 3 ReLU + tanh + action_lim scaling
# ---------------------------------------------------------------------------
def actor_kernel(s_ref, w1_ref, b1_ref, w2_ref, b2_ref, w3_ref, b3_ref,
                 w4_ref, b4_ref, o_ref, *, action_lim):
    def dense(x, w_ref, b_ref):
        # bf16 only at the MXU boundary (weights already stored bf16);
        # f32 accumulation, f32 bias-add / activations.
        return jnp.dot(x.astype(jnp.bfloat16), w_ref[...],
                       preferred_element_type=jnp.float32) + b_ref[...]

    relu = lambda v: jnp.maximum(v, 0.0)
    x = relu(dense(s_ref[...], w1_ref, b1_ref))   # fc1: state_dim -> 256
    x = relu(dense(x, w2_ref, b2_ref))            # fc2: 256 -> 128
    x = relu(dense(x, w3_ref, b3_ref))            # fc3: 128 -> 64 (padded to 128)
    # fc4 + tanh + action_lim scaling.
    o_ref[...] = jnp.tanh(dense(x, w4_ref, b4_ref)) * action_lim


def actor_forward(state, params, action_lim, *, max_tile=4096):
    n, state_dim = state.shape
    action_dim = params["w4"].shape[1]
    tn = _pick_tile(n, max_tile)
    n_steps = pl.cdiv(n, tn)

    def const_spec(arr):
        # Full-shape block + constant index_map: the pipeliner issues exactly
        # one prologue DMA per weight/bias and never re-copies across steps.
        return pl.BlockSpec(arr.shape, lambda i: (0, 0))

    if n_steps > 1:
        # Deeper buffering keeps the very short state DMAs hidden (v7x HBM);
        # fall back gracefully if this JAX version lacks the kwarg.
        try:
            state_spec = pl.BlockSpec((tn, state_dim), lambda i: (i, 0),
                                      pipeline_mode=pl.Buffered(3))
        except TypeError:
            state_spec = pl.BlockSpec((tn, state_dim), lambda i: (i, 0))
    else:
        state_spec = pl.BlockSpec((tn, state_dim), lambda i: (i, 0))

    kernel = functools.partial(actor_kernel, action_lim=float(action_lim))
    return pl.pallas_call(
        kernel,
        out_shape=jax.ShapeDtypeStruct((n, action_dim), jnp.float32),
        grid=(n_steps,),
        in_specs=[state_spec,
                  const_spec(params["w1"]), const_spec(params["b1"]),
                  const_spec(params["w2"]), const_spec(params["b2"]),
                  const_spec(params["w3"]), const_spec(params["b3"]),
                  const_spec(params["w4"]), const_spec(params["b4"])],
        out_specs=pl.BlockSpec((tn, action_dim), lambda i: (i, 0)),
        compiler_params=pltpu.CompilerParams(
            dimension_semantics=("parallel",)),           # shard batch tiles across TCs
    )(state, params["w1"], params["b1"], params["w2"], params["b2"],
      params["w3"], params["b3"], params["w4"], params["b4"])


# ---------------------------------------------------------------------------
# Deterministic synthetic parameter init (nn.Linear defaults + the
# fc4.weight uniform(-EPS, EPS) override from the module's __init__).
# Weights stored bf16 (MXU operand dtype); biases stay f32.
# ---------------------------------------------------------------------------
def init_params(key, state_dim, action_dim):
    def lin(k, fan_in, fan_out):
        kw, kb = jax.random.split(k)
        bound = 1.0 / math.sqrt(fan_in)
        w = jax.random.uniform(kw, (fan_in, fan_out), jnp.float32, -bound, bound)
        b = jax.random.uniform(kb, (1, fan_out), jnp.float32, -bound, bound)
        return w, b

    k1, k2, k3, k4w, k4b = jax.random.split(key, 5)
    w1, b1 = lin(k1, state_dim, 256)
    w2, b2 = lin(k2, 256, 128)
    w3, b3 = lin(k3, 128, 64)
    # Lane-density pad: hidden 64 -> 128. Padded units stay exactly 0 after the
    # ReLU and the matching fc4 rows are 0, so the math is unchanged.
    w3 = jnp.pad(w3, ((0, 0), (0, HID3_PAD - 64)))
    b3 = jnp.pad(b3, ((0, 0), (0, HID3_PAD - 64)))
    w4 = jax.random.uniform(k4w, (64, action_dim), jnp.float32, -EPS, EPS)  # fc4 ~ U(-EPS, EPS)
    w4 = jnp.pad(w4, ((0, HID3_PAD - 64), (0, 0)))
    b4_bound = 1.0 / math.sqrt(64.0)                     # fc4 bias keeps torch default
    b4 = jax.random.uniform(k4b, (1, action_dim), jnp.float32, -b4_bound, b4_bound)
    return {"w1": w1.astype(jnp.bfloat16), "b1": b1,
            "w2": w2.astype(jnp.bfloat16), "b2": b2,
            "w3": w3.astype(jnp.bfloat16), "b3": b3,
            "w4": w4.astype(jnp.bfloat16), "b4": b4}


# ---------------------------------------------------------------------------
# Pure-JAX reference: same (bf16-quantized) weights upcast to f32, f32 math.
# Only the kernel's bf16 activation rounding differs -> loose-but-tight 2e-2.
# ---------------------------------------------------------------------------
def reference_forward(state, p, action_lim):
    hp = jax.lax.Precision.HIGHEST

    def dense(x, w, b):
        return jnp.dot(x, w.astype(jnp.float32), precision=hp) + b

    relu = lambda v: jnp.maximum(v, 0.0)
    x = relu(dense(state, p["w1"], p["b1"]))
    x = relu(dense(x, p["w2"], p["b2"]))
    x = relu(dense(x, p["w3"], p["b3"]))
    return jnp.tanh(dense(x, p["w4"], p["b4"])) * action_lim


if __name__ == "__main__":
    state_dim, action_dim, batch = 32, 8, 2
    action_lim = 2.0
    key = jax.random.PRNGKey(0)
    k_state, k_par, k_big = jax.random.split(key, 3)
    params = init_params(k_par, state_dim, action_dim)

    # 1) Small-batch latency path (single block, matches the DDPG use case).
    state = jax.random.normal(k_state, (batch, state_dim), jnp.float32)
    out = jax.block_until_ready(actor_forward(state, params, action_lim))
    assert out.shape == (batch, action_dim), out.shape
    assert bool(jnp.all(jnp.isfinite(out)))
    assert bool(jnp.all(jnp.abs(out) <= action_lim + 1e-5))   # tanh * action_lim range
    ref = reference_forward(state, params, action_lim)
    assert bool(jnp.allclose(out, ref, atol=2e-2, rtol=2e-2)), (out, ref)

    # 2) Multi-tile path (even grid, Buffered(3) state spec, partial last
    #    block) exercised at small shapes via a reduced max_tile.
    big = jax.random.normal(k_big, (100, state_dim), jnp.float32)
    out_b = jax.block_until_ready(
        actor_forward(big, params, action_lim, max_tile=32))
    ref_b = reference_forward(big, params, action_lim)
    assert out_b.shape == (100, action_dim), out_b.shape
    assert bool(jnp.allclose(out_b, ref_b, atol=2e-2, rtol=2e-2))

    print("KERNEL_OK")
</pallas_src>

<mosaic_0001>
module attributes {stable_mosaic.version = 11 : i64} {
  func.func @actor_kernel(%arg0: i32, %arg1: memref<2x32xf32, #tpu.memory_space<vmem>>, %arg2: memref<32x256xbf16, #tpu.memory_space<vmem>>, %arg3: memref<1x256xf32, #tpu.memory_space<vmem>>, %arg4: memref<256x128xbf16, #tpu.memory_space<vmem>>, %arg5: memref<1x128xf32, #tpu.memory_space<vmem>>, %arg6: memref<128x128xbf16, #tpu.memory_space<vmem>>, %arg7: memref<1x128xf32, #tpu.memory_space<vmem>>, %arg8: memref<128x8xbf16, #tpu.memory_space<vmem>>, %arg9: memref<1x8xf32, #tpu.memory_space<vmem>>, %arg10: memref<2x8xf32, #tpu.memory_space<vmem>>) attributes {dimension_semantics = [#tpu.dimension_semantics<parallel>], iteration_bounds = array<i64: 1>, scalar_prefetch = 0 : i64, scratch_operands = 0 : i64, tpu.core_type = #tpu.core_type<tc>, window_params = [{transform_indices = @transform_0, window_bounds = array<i64: 2, 32>}, {pipeline_mode = #tpu.pipeline_mode<synchronous>, transform_indices = @transform_1, window_bounds = array<i64: 32, 256>}, {pipeline_mode = #tpu.pipeline_mode<synchronous>, transform_indices = @transform_2, window_bounds = array<i64: 1, 256>}, {pipeline_mode = #tpu.pipeline_mode<synchronous>, transform_indices = @transform_3, window_bounds = array<i64: 256, 128>}, {pipeline_mode = #tpu.pipeline_mode<synchronous>, transform_indices = @transform_4, window_bounds = array<i64: 1, 128>}, {pipeline_mode = #tpu.pipeline_mode<synchronous>, transform_indices = @transform_5, window_bounds = array<i64: 128, 128>}, {pipeline_mode = #tpu.pipeline_mode<synchronous>, transform_indices = @transform_6, window_bounds = array<i64: 1, 128>}, {pipeline_mode = #tpu.pipeline_mode<synchronous>, transform_indices = @transform_7, window_bounds = array<i64: 128, 8>}, {pipeline_mode = #tpu.pipeline_mode<synchronous>, transform_indices = @transform_8, window_bounds = array<i64: 1, 8>}, {transform_indices = @transform_9, window_bounds = array<i64: 2, 8>}]} {
    %c0 = arith.constant 0 : index
    %c0_0 = arith.constant 0 : index
    %0 = vector.load %arg1[%c0, %c0_0] : memref<2x32xf32, #tpu.memory_space<vmem>>, vector<2x32xf32>
    %1 = arith.truncf %0 : vector<2x32xf32> to vector<2x32xbf16>
    %c0_1 = arith.constant 0 : index
    %c0_2 = arith.constant 0 : index
    %2 = vector.load %arg2[%c0_1, %c0_2] : memref<32x256xbf16, #tpu.memory_space<vmem>>, vector<32x256xbf16>
    %cst = arith.constant dense<0.000000e+00> : vector<2x256xf32>
    %3 = tpu.matmul %1, %2, %cst {dimension_numbers = #tpu.dot_dimension_numbers<[1], [0], [0], [1], [0, 0, 1, 1], [], []>} : vector<2x32xbf16>, vector<32x256xbf16>, vector<2x256xf32> -> vector<2x256xf32>
    %c0_3 = arith.constant 0 : index
    %c0_4 = arith.constant 0 : index
    %4 = vector.load %arg3[%c0_3, %c0_4] : memref<1x256xf32, #tpu.memory_space<vmem>>, vector<1x256xf32>
    %5 = vector.broadcast %4 : vector<1x256xf32> to vector<2x256xf32>
    %6 = arith.addf %3, %5 : vector<2x256xf32>
    %cst_5 = arith.constant 0.000000e+00 : f32
    %7 = vector.broadcast %cst_5 : f32 to vector<2x256xf32>
    %8 = arith.maximumf %6, %7 : vector<2x256xf32>
    %9 = arith.truncf %8 : vector<2x256xf32> to vector<2x256xbf16>
    %c0_6 = arith.constant 0 : index
    %c0_7 = arith.constant 0 : index
    %10 = vector.load %arg4[%c0_6, %c0_7] : memref<256x128xbf16, #tpu.memory_space<vmem>>, vector<256x128xbf16>
    %cst_8 = arith.constant dense<0.000000e+00> : vector<2x128xf32>
    %11 = tpu.matmul %9, %10, %cst_8 {dimension_numbers = #tpu.dot_dimension_numbers<[1], [0], [0], [1], [0, 0, 1, 1], [], []>} : vector<2x256xbf16>, vector<256x128xbf16>, vector<2x128xf32> -> vector<2x128xf32>
    %c0_9 = arith.constant 0 : index
    %c0_10 = arith.constant 0 : index
    %12 = vector.load %arg5[%c0_9, %c0_10] : memref<1x128xf32, #tpu.memory_space<vmem>>, vector<1x128xf32>
    %13 = vector.broadcast %12 : vector<1x128xf32> to vector<2x128xf32>
    %14 = arith.addf %11, %13 : vector<2x128xf32>
    %cst_11 = arith.constant 0.000000e+00 : f32
    %15 = vector.broadcast %cst_11 : f32 to vector<2x128xf32>
    %16 = arith.maximumf %14, %15 : vector<2x128xf32>
    %17 = arith.truncf %16 : vector<2x128xf32> to vector<2x128xbf16>
    %c0_12 = arith.constant 0 : index
    %c0_13 = arith.constant 0 : index
    %18 = vector.load %arg6[%c0_12, %c0_13] : memref<128x128xbf16, #tpu.memory_space<vmem>>, vector<128x128xbf16>
    %cst_14 = arith.constant dense<0.000000e+00> : vector<2x128xf32>
    %19 = tpu.matmul %17, %18, %cst_14 {dimension_numbers = #tpu.dot_dimension_numbers<[1], [0], [0], [1], [0, 0, 1, 1], [], []>} : vector<2x128xbf16>, vector<128x128xbf16>, vector<2x128xf32> -> vector<2x128xf32>
    %c0_15 = arith.constant 0 : index
    %c0_16 = arith.constant 0 : index
    %20 = vector.load %arg7[%c0_15, %c0_16] : memref<1x128xf32, #tpu.memory_space<vmem>>, vector<1x128xf32>
    %21 = vector.broadcast %20 : vector<1x128xf32> to vector<2x128xf32>
    %22 = arith.addf %19, %21 : vector<2x128xf32>
    %cst_17 = arith.constant 0.000000e+00 : f32
    %23 = vector.broadcast %cst_17 : f32 to vector<2x128xf32>
    %24 = arith.maximumf %22, %23 : vector<2x128xf32>
    %25 = arith.truncf %24 : vector<2x128xf32> to vector<2x128xbf16>
    %c0_18 = arith.constant 0 : index
    %c0_19 = arith.constant 0 : index
    %26 = vector.load %arg8[%c0_18, %c0_19] : memref<128x8xbf16, #tpu.memory_space<vmem>>, vector<128x8xbf16>
    %cst_20 = arith.constant dense<0.000000e+00> : vector<2x8xf32>
    %27 = tpu.matmul %25, %26, %cst_20 {dimension_numbers = #tpu.dot_dimension_numbers<[1], [0], [0], [1], [0, 0, 1, 1], [], []>} : vector<2x128xbf16>, vector<128x8xbf16>, vector<2x8xf32> -> vector<2x8xf32>
    %c0_21 = arith.constant 0 : index
    %c0_22 = arith.constant 0 : index
    %28 = vector.load %arg9[%c0_21, %c0_22] : memref<1x8xf32, #tpu.memory_space<vmem>>, vector<1x8xf32>
    %29 = vector.broadcast %28 : vector<1x8xf32> to vector<2x8xf32>
    %30 = arith.addf %27, %29 : vector<2x8xf32>
    %31 = math.tanh %30 : vector<2x8xf32>
    %cst_23 = arith.constant 2.000000e+00 : f32
    %32 = vector.broadcast %cst_23 : f32 to vector<2x8xf32>
    %33 = arith.mulf %31, %32 : vector<2x8xf32>
    %c0_24 = arith.constant 0 : index
    %c0_25 = arith.constant 0 : index
    %34 = vector.load %arg10[%c0_24, %c0_25] : memref<2x8xf32, #tpu.memory_space<vmem>>, vector<2x8xf32>
    tpu.vector_store %arg10[%c0_24, %c0_25], %33 {strides = array<i32>} : memref<2x8xf32, #tpu.memory_space<vmem>>, vector<2x8xf32>,
    return
  }
  func.func @transform_0(%arg0: i32) -> (i32, i32) {
    %c0_i32 = arith.constant 0 : i32
    %c0_i32_0 = arith.constant 0 : i32
    return %arg0, %c0_i32 : i32, i32
  }
  func.func @transform_1(%arg0: i32) -> (i32, i32) {
    %c0_i32 = arith.constant 0 : i32
    %c0_i32_0 = arith.constant 0 : i32
    %c0_i32_1 = arith.constant 0 : i32
    return %c0_i32, %c0_i32_0 : i32, i32
  }
  func.func @transform_2(%arg0: i32) -> (i32, i32) {
    %c0_i32 = arith.constant 0 : i32
    %c0_i32_0 = arith.constant 0 : i32
    %c0_i32_1 = arith.constant 0 : i32
    return %c0_i32, %c0_i32_0 : i32, i32
  }
  func.func @transform_3(%arg0: i32) -> (i32, i32) {
    %c0_i32 = arith.constant 0 : i32
    %c0_i32_0 = arith.constant 0 : i32
    %c0_i32_1 = arith.constant 0 : i32
    return %c0_i32, %c0_i32_0 : i32, i32
  }
  func.func @transform_4(%arg0: i32) -> (i32, i32) {
    %c0_i32 = arith.constant 0 : i32
    %c0_i32_0 = arith.constant 0 : i32
    %c0_i32_1 = arith.constant 0 : i32
    return %c0_i32, %c0_i32_0 : i32, i32
  }
  func.func @transform_5(%arg0: i32) -> (i32, i32) {
    %c0_i32 = arith.constant 0 : i32
    %c0_i32_0 = arith.constant 0 : i32
    %c0_i32_1 = arith.constant 0 : i32
    return %c0_i32, %c0_i32_0 : i32, i32
  }
  func.func @transform_6(%arg0: i32) -> (i32, i32) {
    %c0_i32 = arith.constant 0 : i32
    %c0_i32_0 = arith.constant 0 : i32
    %c0_i32_1 = arith.constant 0 : i32
    return %c0_i32, %c0_i32_0 : i32, i32
  }
  func.func @transform_7(%arg0: i32) -> (i32, i32) {
    %c0_i32 = arith.constant 0 : i32
    %c0_i32_0 = arith.constant 0 : i32
    %c0_i32_1 = arith.constant 0 : i32
    return %c0_i32, %c0_i32_0 : i32, i32
  }
  func.func @transform_8(%arg0: i32) -> (i32, i32) {
    %c0_i32 = arith.constant 0 : i32
    %c0_i32_0 = arith.constant 0 : i32
    %c0_i32_1 = arith.constant 0 : i32
    return %c0_i32, %c0_i32_0 : i32, i32
  }
  func.func @transform_9(%arg0: i32) -> (i32, i32) {
    %c0_i32 = arith.constant 0 : i32
    %c0_i32_0 = arith.constant 0 : i32
    return %arg0, %c0_i32 : i32, i32
  }
}

</mosaic_0001>

<bundles_post_ra>
// kernel: tpu_custom_call.1
= control target key start
LH: loop header
LB: loop body
LE: loop exit
PB: predicated region body
PF: predicated region fallthrough
CT: control target
= control target key end

     0   :  { %14 = vsyncpa [#allocation3], 0  ;;  %s989_s0 = inlined_call_operand.vmem [shape: f32[2,32], index: 0, kind: input, shape index: {}]   ;;  %s990_s1 = inlined_call_operand.hbm [shape: bf16[32,256], index: 1, kind: input, shape index: {}]   ;;  %s991_s2 = inlined_call_operand.vmem [shape: f32[1,256], index: 2, kind: input, shape index: {}]   ;;  %s992_s3 = inlined_call_operand.hbm [shape: bf16[256,128], index: 3, kind: input, shape index: {}]   ;;  %s993_s4 = inlined_call_operand.vmem [shape: f32[1,128], index: 4, kind: input, shape index: {}]   ;;  %s994_s5 = inlined_call_operand.vmem [shape: bf16[128,128], index: 5, kind: input, shape index: {}]   ;;  %s995_s6 = inlined_call_operand.vmem [shape: f32[1,128], index: 6, kind: input, shape index: {}]   ;;  %s996_s7 = inlined_call_operand.vmem [shape: bf16[128,8], index: 7, kind: input, shape index: {}]   ;;  %s997_s8 = inlined_call_operand.vmem [shape: f32[1,8], index: 8, kind: input, shape index: {}]   ;;  %s998_s9 = inlined_call_operand.hbm [shape: f32[2,8], index: 9, kind: output, shape index: {}]  }
   0x1   :  { %15 = vsyncpa [#allocation6], 0 }
   0x2   :  { %16 = vsyncpa [#allocation4], 0  ;;  %s812_s30 = smov [#allocation2]   ;;  %s740_s13 = scalar_lea.hbm %s990_s1, 512 }
   0x3   :  { %s24_s10 = sshll.u32 %s812_s30, 4  ;;  %p741_p0 = scmp.ne.s32.totalorder %s990_s1, %s740_s13  ;;  %s25_s10 = int_to_ptr.vmem [resolvable:$true] %s24_s10 }
   0x4   :  { %p744_p1 = scmp.lt.u32.totalorder %s740_s13, %s990_s1 }
   0x6   :  { %p746_p2 = pnand %p744_p1, %p741_p0 }
   0x8   :  { %749 = shalt.err (!%p746_p2)
}
   0x9   :  { %s750_s18 = scalar_lea.vmem %s25_s10, 512  ;;  %p755_p4 = scmp.lt.s32.totalorder %s25_s10, %s25_s10 }
   0xa   :  { %p751_p3 = scmp.ne.s32.totalorder %s25_s10, %s750_s18  ;;  %p756_p5 = scmp.lt.s32.totalorder %s750_s18, %s750_s18 }
   0xc   :  { %p757_p6 = por %p756_p5, %p755_p4 }
   0xe   :  { %p758_p7 = pnand %p757_p6, %p751_p3 }
  0x10   :  { %761 = shalt.err (!%p758_p7)
}
  0x11   :  { %s813_s19 = smov 128   ;;  %s814_s20 = smov 8  }
  0x12   :  { %30 = dma.hbm_to_vmem [thread:$0]  %s990_s1, 512, %s25_s10, [#allocation3], %s813_s19, %s813_s19, %s814_s20  }
  0x13   :  { %s815_s23 = smov [#allocation5]   ;;  %s762_s27 = scalar_lea.hbm %s992_s3, 2048 }
  0x14   :  { %s38_s24 = sshll.u32 %s815_s23, 4  ;;  %p763_p8 = scmp.ne.s32.totalorder %s992_s3, %s762_s27  ;;  %s39_s24 = int_to_ptr.vmem [resolvable:$true] %s38_s24 }
  0x15   :  { %p766_p9 = scmp.lt.u32.totalorder %s762_s27, %s992_s3 }
  0x17   :  { %p768_p10 = pnand %p766_p9, %p763_p8 }
  0x19   :  { %771 = shalt.err (!%p768_p10)
}
  0x1a   :  { %s772_s12 = scalar_lea.vmem %s39_s24, 2048  ;;  %p777_p12 = scmp.lt.s32.totalorder %s39_s24, %s39_s24 }
  0x1b   :  { %p773_p11 = scmp.ne.s32.totalorder %s39_s24, %s772_s12  ;;  %p778_p13 = scmp.lt.s32.totalorder %s772_s12, %s772_s12 }
  0x1d   :  { %p779_p0 = por %p778_p13, %p777_p12 }
  0x1f   :  { %p780_p1 = pnand %p779_p0, %p773_p11 }
  0x21   :  { %783 = shalt.err (!%p780_p1)
}
  0x22   :  { %s816_s1 = smov 64   ;;  %s817_s10 = smov 4  }
  0x23   :  { %44 = dma.hbm_to_vmem [thread:$0]  %s992_s3, 2048, %s39_s24, [#allocation6], %s816_s1, %s816_s1, %s817_s10  }
  0x24   :  { %806 = dma.done.wait [#allocation3], 512  }
  0x25   :  { %807 = vsyncadd [#allocation3], 4294966784 }
  0x26   :  { %808 = dma.done.wait [#allocation6], 2048  }
  0x27   :  { %809 = vsyncadd [#allocation6], 4294965248  ;;  %v818_v0 = vmov 0   ;;  %v700_v1 = vld [vmem:[#allocation2 + $0x4] ss:$8 sps:$4 sm:$0xff]   ;;  %vm100_vm0 = vcmask 261120   ;;  %v70_v30 = vlaneseq }
  0x28   :  { %136 = vmatprep.mubr.bf16.mxu0 %v818_v0  ;;  %v702_v2 = vld [vmem:[#allocation2] ss:$8 sps:$4 sm:$0xff]   ;;  %104 = vmatprep.subr.bf16.mxu0 %v700_v1  ;;  %v703_v3 = vld [vmem:[#allocation2 + $0x14] ss:$8 sps:$4 sm:$0xff]   ;;  %v705_v4 = vld [vmem:[#allocation2 + $0x10] ss:$8 sps:$4 sm:$0xff]  }
  0x29   :  { %v62_v5 = vld [vmem:[%s989_s0] sm:$0x3]  ;;  %105 = vmatpush1.bf16.msra.mxu0 %v702_v2  ;;  %v708_v8 = vld [vmem:[#allocation5 + $0x48] sm:$0xff]   ;;  %v710_v11 = vld [vmem:[#allocation5 + $0x50] sm:$0xff]   ;;  %v819_v24 = vmov 0.0   ;;  %v71_v31 = vshrl.u32 %v70_v30, 7 }
  0x2a   :  { %v706_v6 = vld [vmem:[#allocation5 + $0x40] sm:$0xff]   ;;  %106 = vmatprep.subr.bf16.mxu0 %v703_v3  ;;  %v63_v9 = vpack.c.bf16 %v62_v5, %v62_v5  ;;  %v709_v10 = vld [vmem:[#allocation5 + $0x8] sm:$0xff]   ;;  %v711_v12 = vld [vmem:[#allocation5 + $0x10] sm:$0xff]   ;;  %vm820_vm1 = vmmov 0   ;;  %vm552_vm2 = vcmask 58368  }
  0x2b   :  { %v707_v7 = vld [vmem:[#allocation5] sm:$0xff]   ;;  %610 = vmatprep.subr.bf16.mxu1 %v706_v6  ;;  %v712_v13 = vld [vmem:[#allocation5 + $0x58] sm:$0xff]   ;;  %v716_v17 = vld [vmem:[#allocation5 + $0x68] sm:$0xff]   ;;  %v72_v32 = vsub.s32 0, %v71_v31  ;;  %v76_v34 = vsub.s32 1, %v71_v31 }
  0x2c   :  { %611 = vmatpush3.bf16.msra.mxu1 %v707_v7  ;;  %v713_v14 = vld [vmem:[#allocation5 + $0x18] sm:$0xff]   ;;  %v714_v15 = vld [vmem:[#allocation5 + $0x60] sm:$0xff]   ;;  %v717_v18 = vld [vmem:[#allocation5 + $0x28] sm:$0xff]  }
  0x2d   :  { %107 = vmatpush1.bf16.msra.mxu0 %v705_v4  ;;  %612 = vmatprep.subr.bf16.mxu1 %v708_v8  ;;  %v715_v16 = vld [vmem:[#allocation5 + $0x20] sm:$0xff]   ;;  %v718_v19 = vld [vmem:[#allocation5 + $0x70] sm:$0xff]   ;;  %v720_v21 = vld [vmem:[#allocation5 + $0x78] sm:$0xff]  }
  0x2e   :  { %v719_v20 = vld [vmem:[#allocation5 + $0x30] sm:$0xff]   ;;  %v721_v22 = vld [vmem:[#allocation5 + $0x38] sm:$0xff]   ;;  %v722_v23 = vld [vmem:[%s994_s5] sm:$0xff]   ;;  %650 = vmatprep.subr.bf16.mxu0 %v819_v24 }
  0x2f   :  { %v723_v25 = vld [vmem:[%s994_s5 + $0x8] sm:$0xff]   ;;  %v724_v26 = vld [vmem:[%s994_s5 + $0x10] sm:$0xff]   ;;  %v725_v27 = vld [vmem:[%s994_s5 + $0x18] sm:$0xff]  }
  0x30   :  { %574 = vmatmul.mubr.msk.bf16.vlgmr.msra.gmra.mrb[0].mxu0 %vm100_vm0, %v63_v9  ;;  %613 = vmatpush3.bf16.msra.mxu1 %v709_v10  ;;  %v726_v28 = vld [vmem:[%s994_s5 + $0x20] sm:$0xff]   ;;  %v727_v29 = vld [vmem:[%s994_s5 + $0x28] sm:$0xff]   ;;  %v728_v47 = vld [vmem:[%s994_s5 + $0x30] sm:$0xff]  }
  0x31   :  { %614 = vmatprep.subr.bf16.mxu1 %v710_v11  ;;  %651 = vmatpush3.bf16.msra.mxu0 %v722_v23  ;;  %v68_v33 = vld [vmem:[%s991_s2] sm:$0x3]  ;;  %v729_v48 = vld [vmem:[%s994_s5 + $0x38] sm:$0xff]   ;;  %v731_v50 = vld [vmem:[%s996_s7 + $0x8] sm:$0xff]  }
  0x32   :  { %652 = vmatprep.subr.bf16.mxu0 %v819_v24  ;;  %v73_v35 = vrot.slane %v68_v33, %v72_v32  ;;  %v77_v36 = vrot.slane %v68_v33, %v76_v34  ;;  %666 = vmatprep.mubr.msk.bf16.mxu0 %vm820_vm1, %v819_v24  ;;  %v730_v49 = vld [vmem:[%s996_s7] sm:$0xff]   ;;  %v732_v51 = vld [vmem:[%s996_s7 + $0x10] sm:$0xff]   ;;  %v733_v52 = vld [vmem:[%s996_s7 + $0x18] sm:$0xff]  }
  0x33   :  { %v734_v53 = vld [vmem:[%s996_s7 + $0x20] sm:$0xff]   ;;  %v735_v54 = vld [vmem:[%s996_s7 + $0x28] sm:$0xff]   ;;  %v736_v0 = vld [vmem:[%s996_s7 + $0x30] sm:$0xff]  }
  0x34   :  { %615 = vmatpush3.bf16.msra.mxu1 %v711_v12  ;;  %v575_v56 = vld [vmem:[%s993_s4] ss:$0 sm:$0xff]  ;;  %v737_v1 = vld [vmem:[%s996_s7 + $0x38] sm:$0xff]   ;;  %s821_s7 = smov [#allocation7]  }
  0x35   :  { %616 = vmatprep.subr.bf16.mxu1 %v712_v13  ;;  %653 = vmatpush3.bf16.msra.mxu0 %v723_v25  ;;  %v592_v2 = vld [vmem:[%s995_s6] ss:$0 sm:$0xff]  ;;  %s560_s6 = sshll.u32 %s821_s7, 4  ;;  %s561_s6 = int_to_ptr.vmem [resolvable:$true] %s560_s6 }
  0x36   :  { %654 = vmatprep.subr.bf16.mxu0 %v819_v24  ;;  %v601_v10 = vld [vmem:[%s997_s8] ss:$0 sm:$0xff]  ;;  %s784_s28 = scalar_lea.vmem %s561_s6, 32  ;;  %p789_p3 = scmp.lt.s32.totalorder %s561_s6, %s561_s6 }
  0x37   :  { %p785_p2 = scmp.ne.s32.totalorder %s561_s6, %s784_s28  ;;  %p790_p4 = scmp.lt.s32.totalorder %s784_s28, %s784_s28 }
  0x38   :  { %617 = vmatpush3.bf16.msra.mxu1 %v713_v14 }
  0x39   :  { %618 = vmatprep.subr.bf16.mxu1 %v714_v15  ;;  %655 = vmatpush3.bf16.msra.mxu0 %v724_v26  ;;  %p791_p5 = por %p790_p4, %p789_p3 }
  0x3a   :  { %656 = vmatprep.subr.bf16.mxu0 %v819_v24 }
  0x3b   :  { %p792_p6 = pnand %p791_p5, %p785_p2 }
  0x3c   :  { %619 = vmatpush3.bf16.msra.mxu1 %v715_v16 }
  0x3d   :  { %620 = vmatprep.subr.bf16.mxu1 %v716_v17  ;;  %657 = vmatpush3.bf16.msra.mxu0 %v725_v27 }
  0x3e   :  { %658 = vmatprep.subr.bf16.mxu0 %v819_v24 }
  0x40   :  { %621 = vmatpush3.bf16.msra.mxu1 %v717_v18 }
  0x41   :  { %622 = vmatprep.subr.bf16.mxu1 %v718_v19  ;;  %659 = vmatpush3.bf16.msra.mxu0 %v726_v28 }
  0x42   :  { %660 = vmatprep.subr.bf16.mxu0 %v819_v24 }
  0x44   :  { %623 = vmatpush3.bf16.msra.mxu1 %v719_v20 }
  0x45   :  { %624 = vmatprep.subr.bf16.mxu1 %v720_v21  ;;  %661 = vmatpush3.bf16.msra.mxu0 %v727_v29 }
  0x46   :  { %662 = vmatprep.subr.bf16.mxu0 %v819_v24 }
  0x48   :  { %625 = vmatpush3.bf16.msra.mxu1 %v721_v22 }
  0x49   :  { %670 = vmatprep.subr.bf16.mxu1 %v819_v24  ;;  %663 = vmatpush3.bf16.msra.mxu0 %v728_v47 }
  0x4a   :  { %664 = vmatprep.subr.bf16.mxu0 %v819_v24 }
  0x4d   :  { %665 = vmatpush3.bf16.msra.mxu0 %v729_v48 }
 0x103   :  { %v138_v37 = vpop.f32.mrb[0].mxu0 }
 0x104   :  { %v139_v38 = vadd.f32 %v138_v37, %v73_v35  ;;  %v140_v39 = vpop.f32.mrb[1].mxu0 }
 0x105   :  { %v141_v40 = vadd.f32 %v140_v39, %v77_v36  ;;  %v142_v41 = vpop.f32.mrb[2].mxu0 }
 0x106   :  { %v145_v42 = vmax.f32 %v139_v38, 0.0  ;;  %v143_v43 = vpop.f32.mrb[3].mxu0 }
 0x107   :  { %v146_v44 = vmax.f32 %v141_v40, 0.0 }
 0x108   :  { %v147_v46 = vpack.c.bf16 %v145_v42, %v145_v42 }
 0x109   :  { %v148_v45 = vpack.c.bf16 %v146_v44, %v146_v44 }
 0x10b   :  { %316 = vmatprep.mubr.bf16.mxu1 %v148_v45 }
 0x10c   :  { %317 = vmatmul.mubr.bf16.vlgmr.msra.gmra.mrb[0].mxu1 %v147_v46 }
 0x10d   :  { %686 = vmatprep.mubr.msk.bf16.mxu1 %vm820_vm1, %v819_v24  ;;  %671 = vmatpush3.bf16.msra.mxu1 %v730_v49 }
 0x10e   :  { %672 = vmatprep.subr.bf16.mxu1 %v819_v24 }
 0x111   :  { %673 = vmatpush3.bf16.msra.mxu1 %v731_v50 }
 0x112   :  { %674 = vmatprep.subr.bf16.mxu1 %v819_v24 }
 0x115   :  { %675 = vmatpush3.bf16.msra.mxu1 %v732_v51 }
 0x116   :  { %676 = vmatprep.subr.bf16.mxu1 %v819_v24 }
 0x119   :  { %677 = vmatpush3.bf16.msra.mxu1 %v733_v52 }
 0x11a   :  { %678 = vmatprep.subr.bf16.mxu1 %v819_v24 }
 0x11d   :  { %679 = vmatpush3.bf16.msra.mxu1 %v734_v53 }
 0x11e   :  { %680 = vmatprep.subr.bf16.mxu1 %v819_v24 }
 0x121   :  { %681 = vmatpush3.bf16.msra.mxu1 %v735_v54 }
 0x122   :  { %682 = vmatprep.subr.bf16.mxu1 %v819_v24 }
 0x125   :  { %683 = vmatpush3.bf16.msra.mxu1 %v736_v0 }
 0x126   :  { %684 = vmatprep.subr.bf16.mxu1 %v819_v24 }
 0x129   :  { %685 = vmatpush3.bf16.msra.mxu1 %v737_v1 }
 0x1df   :  { %v626_v55 = vpop.f32.mrb[0].mxu1 }
 0x1e0   :  { %v627_v57 = vpop.f32.mrb[1].mxu1 }
 0x1e1   :  { %v628_v58 = vadd.f32 %v627_v57, %v626_v55  ;;  %v629_v59 = vpop.f32.mrb[2].mxu1 }
 0x1e2   :  { %v630_v60 = vpop.f32.mrb[3].mxu1 }
 0x1e3   :  { %v319_v61 = vadd.f32 %v628_v58, %v575_v56 }
 0x1e5   :  { %v324_v62 = vmax.f32 %v319_v61, 0.0 }
 0x1e7   :  { %v325_v63 = vpack.c.bf16 %v324_v62, %v324_v62 }
 0x1e9   :  { %667 = vmatmul.mubr.bf16.vlgmr.msra.gmra.mrb[4].mxu0 %v325_v63 }
 0x2bc   :  { %v431_v3 = vpop.f32.mrb[4].mxu0 }
 0x2bd   :  { %v432_v4 = vadd.f32 %v592_v2, %v431_v3  ;;  %v668_v5 = vpop.f32.mrb[5].mxu0 }
 0x2be   :  { %v434_v6 = vpop.f32.mrb[6].mxu0 }
 0x2bf   :  { %v437_v7 = vmax.f32 %v432_v4, 0.0  ;;  %v669_v8 = vpop.f32.mrb[7].mxu0 }
 0x2c1   :  { %v438_v9 = vpack.c.bf16 %v437_v7, %v437_v7 }
 0x2c3   :  { %687 = vmatmul.mubr.bf16.vlgmr.msra.gmra.mrb[4].mxu1 %v438_v9 }
 0x396   :  { %v544_v11 = vpop.f32.mrb[4].mxu1 }
 0x397   :  { %v545_v12 = vadd.f32 %v601_v10, %v544_v11  ;;  %v688_v13 = vpop.f32.mrb[5].mxu1 }
 0x398   :  { %v547_v14 = vpop.f32.mrb[6].mxu1 }
 0x399   :  { %738 = vtanh.f32 %v545_v12  ;;  %v689_v15 = vpop.f32.mrb[7].mxu1 }
 0x3a3   :  { %v739_v16 = vpop.eup %738 }
 0x3a4   :  { %v551_v17 = vmul.f32 2.0, %v739_v16 }
 0x3a6   :  { %553 = vst.msk [vmem:[#allocation7] sm:$0x3] %vm552_vm2, %v551_v17 }
 0x3a7   :  { %795 = shalt.err (!%p792_p6)
}
 0x3a8   :  { %s796_s30 = scalar_lea.hbm %s998_s9, 32 }
 0x3a9   :  { %p797_p7 = scmp.ne.s32.totalorder %s998_s9, %s796_s30  ;;  %p800_p8 = scmp.lt.u32.totalorder %s796_s30, %s998_s9 }
 0x3ab   :  { %p802_p9 = pnand %p800_p8, %p797_p7 }
 0x3ad   :  { %805 = shalt.err (!%p802_p9)
}
 0x3ae   :  { %563 = dma.vmem_to_hbm [thread:$0]  %s561_s6, 32, %s998_s9, [#allocation4]  }
 0x3af   :  { %810 = dma.done.wait [#allocation4], 32  }
 0x3b0   :  { %811 = vsyncadd [#allocation4], 4294967264 }
 0x3b1   :  { %567 = vsyncpa [#allocation3], 1 }
 0x3b2   :  { %568 = vsyncpa [#allocation6], 1 }
 0x3b3   :  { %569 = vsyncpa [#allocation4], 1 }

</bundles_post_ra>
